<compile_context>
chip_gen: v7x
topology: tpu7x:2x2x1
jax: 0.10.0
libtpu: 0.0.40
codegen_flags: <defaults>
</compile_context>

<pallas_src>
import functools

import jax
import jax.numpy as jnp
from jax.experimental import pallas as pl
from jax.experimental.pallas import tpu as pltpu

ALPHA = 1.0
GAMMA = 2.0
XENT = 0.1

BATCH = 240          # not a multiple of 128 -> exercises the tail mask
NUM_CLASSES = 5      # stand-in for CFG.target_size


def _focal_cosine_kernel(x_ref, t_ref, out_ref, acc_ref, *,
                         alpha, gamma, xent, n_valid, inner_grid):
    i = pl.program_id(0)     # partial-sum axis ("parallel"; TC-shardable on v7x)
    j = pl.program_id(1)     # batch-chunk axis ("arbitrary"; accumulated)

    @pl.when(j == 0)
    def _init():
        acc_ref[...] = jnp.zeros_like(acc_ref)

    x = x_ref[...].astype(jnp.float32)          # (C, T) classes on sublanes, batch on lanes
    t = t_ref[...]                              # (1, T) int32

    c, tt = x.shape

    # Global column ids of this logical block.  Tail / phantom columns (no pad
    # in the wrapper) get zero-masked inputs and are excluded from the sum.
    blk = i * inner_grid + j
    col = blk * tt + jax.lax.broadcasted_iota(jnp.int32, (1, tt), 1)
    valid = col < n_valid                                    # (1, T)
    x = jnp.where(valid, x, 0.0)
    t = jnp.where(valid, t, 0)

    classes = jax.lax.broadcasted_iota(jnp.int32, (c, tt), 0)
    onehot = (classes == t).astype(jnp.float32)              # (C, T)

    # Per-sample squared L2 norm and logit at the target class
    # (masked sublane reduce over the small class axis, no gather needed).
    sumsq = jnp.sum(x * x, axis=0, keepdims=True)            # (1, T)
    x_t = jnp.sum(onehot * x, axis=0, keepdims=True)         # (1, T)

    # --- cosine embedding loss, y = +1, ||one_hot|| == 1 ---------------------
    # 1 - x_t / max(||x||, 1e-8)  ==  1 - x_t * rsqrt(max(sumsq, 1e-16))
    inv_norm_cos = jax.lax.rsqrt(jnp.maximum(sumsq, 1e-16))
    cos_loss = 1.0 - x_t * inv_norm_cos                      # (1, T)

    # --- cross entropy on F.normalize(x) (eps = 1e-12), numerically stable ---
    inv_norm = jax.lax.rsqrt(jnp.maximum(sumsq, 1e-24))      # (1, T)
    xn = x * inv_norm                                        # (C, T)
    m = jnp.max(xn, axis=0, keepdims=True)                   # (1, T)
    ez = jnp.exp(xn - m)                                     # (C, T)  single big EUP op
    se = jnp.sum(ez, axis=0, keepdims=True)                  # (1, T)
    xn_t = x_t * inv_norm                                    # normalized logit at target
    cent = jnp.log(se) + m - xn_t                            # -log_softmax[target], (1, T)

    # --- focal weighting ------------------------------------------------------
    # pt = softmax prob at target; reuse ez instead of a second exp(-cent).
    ez_t = jnp.sum(onehot * ez, axis=0, keepdims=True)       # (1, T)
    pt = ez_t / se
    one_minus_pt = 1.0 - pt
    if gamma == 2.0:                                         # static specialization
        focal_w = one_minus_pt * one_minus_pt
    else:
        focal_w = jnp.power(one_minus_pt, gamma)
    focal = alpha * focal_w * cent

    # Fused per-sample loss; mean(cos) + xent*mean(focal) == mean(cos + xent*focal)
    combined = jnp.where(valid, cos_loss + xent * focal, 0.0)
    acc_ref[...] += jnp.sum(combined, axis=1, keepdims=True)  # (1, 1) running sum

    @pl.when(j == pl.num_programs(1) - 1)
    def _finalize():
        # Lane-dense (1, 128) store of this partial sum (broadcast scalar).
        out_ref[...] = jnp.broadcast_to(acc_ref[...], out_ref.shape)


def focal_cosine_loss(logits, targets, alpha=ALPHA, gamma=GAMMA, xent=XENT,
                      tile_n=None, num_partials=2, class_major=False):
    """Focal-cosine loss (reduction='mean') -> scalar f32.

    logits: (N, C) float (f32 or bf16), or (C, N) if class_major=True.
    targets: (N,) int.
    """
    if class_major:
        c, n = logits.shape
        x = logits                                       # already (C, N): no HBM pass
    else:
        n, c = logits.shape
        # TODO(synk): have the producing matmul emit class-major (C, N) logits so
        # this transpose (a full read+write of the logits at large N) disappears.
        x = jnp.transpose(logits)                        # (C, N)
    t = targets.astype(jnp.int32).reshape(1, n)          # (1, N)  metadata-only reshape

    lane = 128
    if tile_n is None:
        # Big lane-aligned tiles: step overhead & DMA efficiency, not VMEM, dominate.
        tile_n = min(((n + lane - 1) // lane) * lane, 32768)
    tile_n = max(lane, (tile_n // lane) * lane)

    n_blocks = pl.cdiv(n, tile_n)                        # no padding: tail mask in-kernel
    p = max(1, min(int(num_partials), n_blocks))         # partial sums (v7x: 2 TCs)
    inner_grid = pl.cdiv(n_blocks, p)                    # blocks per partial
    last_blk = n_blocks - 1                              # clamp phantom blocks

    def x_map(i, j):
        return (0, jnp.minimum(i * inner_grid + j, last_blk))

    def t_map(i, j):
        return (0, jnp.minimum(i * inner_grid + j, last_blk))

    kernel = functools.partial(
        _focal_cosine_kernel,
        alpha=float(alpha), gamma=float(gamma), xent=float(xent),
        n_valid=n, inner_grid=inner_grid,
    )

    # Double-buffered (sublane-padded) logits + targets tiles, with headroom.
    c_pad = 8 * ((c + 7) // 8)
    vmem_need = 2 * (c_pad + 8) * tile_n * 4
    vmem_limit = int(min(max(4 * vmem_need, 32 * 1024 * 1024), 48 * 1024 * 1024))

    partials = pl.pallas_call(
        kernel,
        out_shape=jax.ShapeDtypeStruct((p, lane), jnp.float32),
        grid_spec=pltpu.PrefetchScalarGridSpec(
            num_scalar_prefetch=0,
            grid=(p, inner_grid),
            in_specs=[
                pl.BlockSpec((c, tile_n), x_map),            # logits tile (C, T)
                pl.BlockSpec((1, tile_n), t_map),            # targets tile (1, T)
            ],
            out_specs=pl.BlockSpec((1, lane), lambda i, j: (i, 0)),  # per-partial row
            scratch_shapes=[pltpu.VMEM((1, 1), jnp.float32)],        # running sum
        ),
        # Leading partial axis is independent ("parallel": shardable across the
        # 2 TensorCores on v7x); the inner batch axis accumulates -> "arbitrary".
        # TODO(synk): on v7x, consider pltpu.CORE_PARALLEL / pl.core_map for an
        # explicit per-core split instead of relying on megacore auto-sharding.
        compiler_params=pltpu.CompilerParams(
            dimension_semantics=("parallel", "arbitrary"),
            vmem_limit_bytes=vmem_limit,
        ),
    )(x, t)
    return jnp.sum(partials[:, 0]) / n


def _reference(logits, targets, alpha=ALPHA, gamma=GAMMA, xent=XENT):
    # Pure-JAX mirror of the PyTorch forward (reduction='mean').
    x = logits.astype(jnp.float32)
    onehot = jax.nn.one_hot(targets, x.shape[-1], dtype=jnp.float32)
    norm = jnp.sqrt(jnp.sum(x * x, axis=-1))
    cos_sim = jnp.sum(x * onehot, axis=-1) / jnp.maximum(norm, 1e-8)
    cosine_loss = jnp.mean(1.0 - cos_sim)
    xn = x / jnp.maximum(norm, 1e-12)[:, None]
    logp = jax.nn.log_softmax(xn, axis=-1)
    cent = -jnp.sum(onehot * logp, axis=-1)
    pt = jnp.exp(-cent)
    focal = alpha * (1.0 - pt) ** gamma * cent
    return cosine_loss + xent * jnp.mean(focal)


if __name__ == "__main__":
    key = jax.random.PRNGKey(0)
    k1, k2 = jax.random.split(key)
    logits = jax.random.normal(k1, (BATCH, NUM_CLASSES), dtype=jnp.float32)
    targets = jax.random.randint(k2, (BATCH,), 0, NUM_CLASSES, dtype=jnp.int32)

    ref = _reference(logits, targets)

    # Default path: tile_n derived from N (single lane-aligned tile, tail mask).
    out1 = jax.block_until_ready(focal_cosine_loss(logits, targets))
    assert jnp.allclose(out1, ref, atol=1e-5, rtol=1e-4), (out1, ref)

    # Small-tile path: exercises the 2-way partial-sum split + tail mask.
    out2 = jax.block_until_ready(focal_cosine_loss(logits, targets, tile_n=128))
    assert jnp.allclose(out2, ref, atol=1e-5, rtol=1e-4), (out2, ref)

    # Class-major path: caller provides (C, N) logits -> no wrapper transpose pass.
    out3 = jax.block_until_ready(
        focal_cosine_loss(jnp.transpose(logits), targets, class_major=True))
    assert jnp.allclose(out3, ref, atol=1e-5, rtol=1e-4), (out3, ref)

    # bf16 logits: halves the dominant HBM stream; math stays f32 in-kernel.
    logits_bf16 = logits.astype(jnp.bfloat16)
    ref_bf16 = _reference(logits_bf16.astype(jnp.float32), targets)
    out4 = jax.block_until_ready(focal_cosine_loss(logits_bf16, targets))
    assert jnp.allclose(out4, ref_bf16, atol=1e-5, rtol=1e-4), (out4, ref_bf16)

    print("KERNEL_OK")
</pallas_src>

<mosaic_0001>
module attributes {stable_mosaic.version = 11 : i64} {
  func.func @_focal_cosine_kernel(%arg0: i32, %arg1: i32, %arg2: memref<5x256xf32, #tpu.memory_space<vmem>>, %arg3: memref<1x256xi32, #tpu.memory_space<vmem>>, %arg4: memref<1x128xf32, #tpu.memory_space<vmem>>, %arg5: memref<1x1xf32, #tpu.memory_space<vmem>>) attributes {dimension_semantics = [#tpu.dimension_semantics<parallel>, #tpu.dimension_semantics<arbitrary>], iteration_bounds = array<i64: 1, 1>, scalar_prefetch = 0 : i64, scratch_operands = 1 : i64, tpu.core_type = #tpu.core_type<tc>, window_params = [{transform_indices = @transform_0, window_bounds = array<i64: 5, 256>}, {transform_indices = @transform_1, window_bounds = array<i64: 1, 256>}, {transform_indices = @transform_2, window_bounds = array<i64: 1, 128>}]} {
    %c0_i32 = arith.constant 0 : i32
    %0 = arith.cmpi eq, %arg1, %c0_i32 : i32
    %1 = arith.extui %0 : i1 to i32
    %c0_i32_0 = arith.constant 0 : i32
    %2 = arith.cmpi ne, %1, %c0_i32_0 : i32
    scf.if %2 {
      %cst_24 = arith.constant 0.000000e+00 : f32
      %75 = vector.broadcast %cst_24 : f32 to vector<1x1xf32>
      %c0_25 = arith.constant 0 : index
      %c0_26 = arith.constant 0 : index
      %76 = vector.load %arg5[%c0_25, %c0_26] : memref<1x1xf32, #tpu.memory_space<vmem>>, vector<1x1xf32>
      tpu.vector_store %arg5[%c0_25, %c0_26], %75 {strides = array<i32>} : memref<1x1xf32, #tpu.memory_space<vmem>>, vector<1x1xf32>,
    } else {
    }
    %c0 = arith.constant 0 : index
    %c0_1 = arith.constant 0 : index
    %3 = vector.load %arg2[%c0, %c0_1] : memref<5x256xf32, #tpu.memory_space<vmem>>, vector<5x256xf32>
    %c0_2 = arith.constant 0 : index
    %c0_3 = arith.constant 0 : index
    %4 = vector.load %arg3[%c0_2, %c0_3] : memref<1x256xi32, #tpu.memory_space<vmem>>, vector<1x256xi32>
    %c1_i32 = arith.constant 1 : i32
    %5 = arith.muli %arg0, %c1_i32 : i32
    %6 = arith.addi %5, %arg1 : i32
    %c256_i32 = arith.constant 256 : i32
    %7 = arith.muli %6, %c256_i32 : i32
    %8 = tpu.iota {dimensions = array<i32: 1>} : vector<1x256xi32>
    %9 = vector.broadcast %7 : i32 to vector<1x256xi32>
    %10 = arith.addi %9, %8 : vector<1x256xi32>
    %c240_i32 = arith.constant 240 : i32
    %11 = vector.broadcast %c240_i32 : i32 to vector<1x256xi32>
    %12 = arith.cmpi slt, %10, %11 : vector<1x256xi32>
    %cst = arith.constant 0.000000e+00 : f32
    %13 = vector.shape_cast %12 : vector<1x256xi1> to vector<1x256xi1>
    %14 = vector.broadcast %13 : vector<1x256xi1> to vector<5x256xi1>
    %15 = vector.broadcast %cst : f32 to vector<5x256xf32>
    %16 = arith.select %14, %3, %15 : vector<5x256xi1>, vector<5x256xf32>
    %c0_i32_4 = arith.constant 0 : i32
    %17 = vector.broadcast %c0_i32_4 : i32 to vector<1x256xi32>
    %18 = arith.select %12, %4, %17 : vector<1x256xi1>, vector<1x256xi32>
    %19 = tpu.iota {dimensions = array<i32: 0>} : vector<5x256xi32>
    %20 = vector.broadcast %18 : vector<1x256xi32> to vector<5x256xi32>
    %21 = arith.cmpi eq, %19, %20 : vector<5x256xi32>
    %22 = arith.extui %21 : vector<5x256xi1> to vector<5x256xi32>
    %23 = arith.sitofp %22 : vector<5x256xi32> to vector<5x256xf32>
    %24 = arith.mulf %16, %16 : vector<5x256xf32>
    %cst_5 = arith.constant dense<0.000000e+00> : vector<256xf32>
    %25 = vector.multi_reduction <add>, %24, %cst_5 [0] : vector<5x256xf32> to vector<256xf32>
    %26 = vector.shape_cast %25 : vector<256xf32> to vector<1x256xf32>
    %27 = arith.mulf %23, %16 : vector<5x256xf32>
    %cst_6 = arith.constant dense<0.000000e+00> : vector<256xf32>
    %28 = vector.multi_reduction <add>, %27, %cst_6 [0] : vector<5x256xf32> to vector<256xf32>
    %29 = vector.shape_cast %28 : vector<256xf32> to vector<1x256xf32>
    %cst_7 = arith.constant 1.000000e-16 : f32
    %30 = vector.broadcast %cst_7 : f32 to vector<1x256xf32>
    %31 = arith.maximumf %26, %30 : vector<1x256xf32>
    %32 = math.rsqrt %31 : vector<1x256xf32>
    %33 = arith.mulf %29, %32 : vector<1x256xf32>
    %cst_8 = arith.constant 1.000000e+00 : f32
    %34 = vector.broadcast %cst_8 : f32 to vector<1x256xf32>
    %35 = arith.subf %34, %33 : vector<1x256xf32>
    %cst_9 = arith.constant 1.000000e-24 : f32
    %36 = vector.broadcast %cst_9 : f32 to vector<1x256xf32>
    %37 = arith.maximumf %26, %36 : vector<1x256xf32>
    %38 = math.rsqrt %37 : vector<1x256xf32>
    %39 = vector.broadcast %38 : vector<1x256xf32> to vector<5x256xf32>
    %40 = arith.mulf %16, %39 : vector<5x256xf32>
    %cst_10 = arith.constant dense<0xFF800000> : vector<256xf32>
    %41 = vector.multi_reduction <maximumf>, %40, %cst_10 [0] : vector<5x256xf32> to vector<256xf32>
    %42 = vector.shape_cast %41 : vector<256xf32> to vector<1x256xf32>
    %43 = vector.broadcast %42 : vector<1x256xf32> to vector<5x256xf32>
    %44 = arith.subf %40, %43 : vector<5x256xf32>
    %45 = math.exp %44 : vector<5x256xf32>
    %cst_11 = arith.constant dense<0.000000e+00> : vector<256xf32>
    %46 = vector.multi_reduction <add>, %45, %cst_11 [0] : vector<5x256xf32> to vector<256xf32>
    %47 = vector.shape_cast %46 : vector<256xf32> to vector<1x256xf32>
    %48 = arith.mulf %29, %38 : vector<1x256xf32>
    %49 = math.log %47 : vector<1x256xf32>
    %50 = arith.addf %49, %42 : vector<1x256xf32>
    %51 = arith.subf %50, %48 : vector<1x256xf32>
    %52 = arith.mulf %23, %45 : vector<5x256xf32>
    %cst_12 = arith.constant dense<0.000000e+00> : vector<256xf32>
    %53 = vector.multi_reduction <add>, %52, %cst_12 [0] : vector<5x256xf32> to vector<256xf32>
    %54 = vector.shape_cast %53 : vector<256xf32> to vector<1x256xf32>
    %55 = arith.divf %54, %47 : vector<1x256xf32>
    %cst_13 = arith.constant 1.000000e+00 : f32
    %56 = vector.broadcast %cst_13 : f32 to vector<1x256xf32>
    %57 = arith.subf %56, %55 : vector<1x256xf32>
    %58 = arith.mulf %57, %57 : vector<1x256xf32>
    %cst_14 = arith.constant 1.000000e+00 : f32
    %59 = vector.broadcast %cst_14 : f32 to vector<1x256xf32>
    %60 = arith.mulf %59, %58 : vector<1x256xf32>
    %61 = arith.mulf %60, %51 : vector<1x256xf32>
    %cst_15 = arith.constant 1.000000e-01 : f32
    %62 = vector.broadcast %cst_15 : f32 to vector<1x256xf32>
    %63 = arith.mulf %62, %61 : vector<1x256xf32>
    %64 = arith.addf %35, %63 : vector<1x256xf32>
    %cst_16 = arith.constant 0.000000e+00 : f32
    %65 = vector.broadcast %cst_16 : f32 to vector<1x256xf32>
    %66 = arith.select %12, %64, %65 : vector<1x256xi1>, vector<1x256xf32>
    %c0_17 = arith.constant 0 : index
    %c0_18 = arith.constant 0 : index
    %67 = vector.load %arg5[%c0_17, %c0_18] : memref<1x1xf32, #tpu.memory_space<vmem>>, vector<1x1xf32>
    %cst_19 = arith.constant dense<0.000000e+00> : vector<1xf32>
    %68 = vector.multi_reduction <add>, %66, %cst_19 [1] : vector<1x256xf32> to vector<1xf32>
    %69 = vector.shape_cast %68 : vector<1xf32> to vector<1x1xf32>
    %70 = arith.addf %67, %69 : vector<1x1xf32>
    %c0_20 = arith.constant 0 : index
    %c0_21 = arith.constant 0 : index
    %71 = vector.load %arg5[%c0_20, %c0_21] : memref<1x1xf32, #tpu.memory_space<vmem>>, vector<1x1xf32>
    tpu.vector_store %arg5[%c0_20, %c0_21], %70 {strides = array<i32>} : memref<1x1xf32, #tpu.memory_space<vmem>>, vector<1x1xf32>,
    %c0_i32_22 = arith.constant 0 : i32
    %72 = arith.cmpi eq, %arg1, %c0_i32_22 : i32
    %73 = arith.extui %72 : i1 to i32
    %c0_i32_23 = arith.constant 0 : i32
    %74 = arith.cmpi ne, %73, %c0_i32_23 : i32
    scf.if %74 {
      %c0_24 = arith.constant 0 : index
      %c0_25 = arith.constant 0 : index
      %75 = vector.load %arg5[%c0_24, %c0_25] : memref<1x1xf32, #tpu.memory_space<vmem>>, vector<1x1xf32>
      %76 = vector.shape_cast %75 : vector<1x1xf32> to vector<1x1xf32>
      %77 = vector.broadcast %76 : vector<1x1xf32> to vector<1x128xf32>
      %c0_26 = arith.constant 0 : index
      %c0_27 = arith.constant 0 : index
      %78 = vector.load %arg4[%c0_26, %c0_27] : memref<1x128xf32, #tpu.memory_space<vmem>>, vector<1x128xf32>
      tpu.vector_store %arg4[%c0_26, %c0_27], %77 {strides = array<i32>} : memref<1x128xf32, #tpu.memory_space<vmem>>, vector<1x128xf32>,
    } else {
    }
    return
  }
  func.func @transform_0(%arg0: i32, %arg1: i32) -> (i32, i32) {
    %c1_i32 = arith.constant 1 : i32
    %0 = arith.muli %arg0, %c1_i32 : i32
    %1 = arith.addi %0, %arg1 : i32
    %c0_i32 = arith.constant 0 : i32
    %2 = arith.minsi %1, %c0_i32 : i32
    %c0_i32_0 = arith.constant 0 : i32
    %c0_i32_1 = arith.constant 0 : i32
    return %c0_i32_0, %2 : i32, i32
  }
  func.func @transform_1(%arg0: i32, %arg1: i32) -> (i32, i32) {
    %c1_i32 = arith.constant 1 : i32
    %0 = arith.muli %arg0, %c1_i32 : i32
    %1 = arith.addi %0, %arg1 : i32
    %c0_i32 = arith.constant 0 : i32
    %2 = arith.minsi %1, %c0_i32 : i32
    %c0_i32_0 = arith.constant 0 : i32
    %c0_i32_1 = arith.constant 0 : i32
    return %c0_i32_0, %2 : i32, i32
  }
  func.func @transform_2(%arg0: i32, %arg1: i32) -> (i32, i32) {
    %c0_i32 = arith.constant 0 : i32
    %c0_i32_0 = arith.constant 0 : i32
    return %arg0, %c0_i32 : i32, i32
  }
}

</mosaic_0001>

<bundles_post_ra>
// kernel: tpu_custom_call.1
= control target key start
LH: loop header
LB: loop body
LE: loop exit
PB: predicated region body
PF: predicated region fallthrough
CT: control target
= control target key end

     0   :  { %7 = vsyncpa [#allocation4], 0  ;;  %s448_s0 = inlined_call_operand.hbm [shape: f32[5,240], index: 0, kind: input, shape index: {}]   ;;  %s449_s1 = inlined_call_operand.vmem [shape: s32[1,240], index: 1, kind: input, shape index: {}]   ;;  %s450_s2 = inlined_call_operand.hbm [shape: f32[1,128], index: 2, kind: output, shape index: {}]  }
   0x1   :  { %8 = vsyncpa [#allocation5], 0  ;;  %s353_s9 = smov [#allocation3]   ;;  %s305_s13 = scalar_lea.hbm %s448_s0, 256 }
   0x2   :  { %s21_s10 = sshll.u32 %s353_s9, 4  ;;  %p306_p0 = scmp.ne.s32.totalorder %s448_s0, %s305_s13  ;;  %s22_s10 = int_to_ptr.vmem [resolvable:$true] %s21_s10 }
   0x3   :  { %p309_p1 = scmp.lt.u32.totalorder %s305_s13, %s448_s0 }
   0x5   :  { %p311_p2 = pnand %p309_p1, %p306_p0 }
   0x7   :  { %314 = shalt.err (!%p311_p2)
}
   0x8   :  { %s315_s18 = scalar_lea.vmem %s22_s10, 256  ;;  %p320_p4 = scmp.lt.s32.totalorder %s22_s10, %s22_s10 }
   0x9   :  { %p316_p3 = scmp.ne.s32.totalorder %s22_s10, %s315_s18  ;;  %p321_p5 = scmp.lt.s32.totalorder %s315_s18, %s315_s18 }
   0xb   :  { %p322_p6 = por %p321_p5, %p320_p4 }
   0xd   :  { %p323_p7 = pnand %p322_p6, %p316_p3 }
   0xf   :  { %326 = shalt.err (!%p323_p7)
}
  0x10   :  { %24 = dma.hbm_to_vmem [thread:$0]  %s448_s0, 256, %s22_s10, [#allocation4]  }
  0x11   :  { %349 = dma.done.wait [#allocation4], 256  }
  0x12   :  { %350 = vsyncadd [#allocation4], 4294967040  ;;  %vm67_vm0 = vcmask 0   ;;  %v74_v0 = vlaneseq  ;;  %v354_v1 = vmov 0.0   ;;  %vm116_vm2 = vcmask 1044480  }
  0x13   :  { %68 = vst.msk [vmem:[#allocation2] sm:$0x1] %vm67_vm0, %v354_v1  ;;  %v69_v7 = vld [vmem:[#allocation3] sm:$0x1f]  ;;  %v70_v8 = vld [vmem:[#allocation3 + $0x8] sm:$0x1f] }
  0x14   :  { %v75_v2 = vand.u32 127, %v74_v0  ;;  %v89_v3 = vshrl.u32 %v74_v0, 7  ;;  %v71_v9 = vld [vmem:[%s449_s1] sm:$0x3]  ;;  %v114_v13 = vmul.f32 %v69_v7, %v69_v7  ;;  %s356_s1 = smov [#allocation6]  }
  0x15   :  { %s264_s22 = sshll.u32 %s356_s1, 4  ;;  %s265_s22 = int_to_ptr.vmem [resolvable:$true] %s264_s22 }
  0x16   :  { %v385_v4 = vadd.s32 128, %v75_v2  ;;  %v387_v5 = vsub.s32 0, %v89_v3  ;;  %v94_v6 = vsub.s32 1, %v89_v3  ;;  %v117_v17 = vsel %vm116_vm2, %v114_v13, 0.0  ;;  %s327_s23 = scalar_lea.vmem %s265_s22, 16  ;;  %s331_s24 = scalar_lea.vmem %s265_s22, 32 }
  0x17   :  { %v118_v19 = vrot.slane %v117_v17, 4  ;;  %p328_p8 = scmp.ne.s32.totalorder %s265_s22, %s327_s23  ;;  %p332_p9 = scmp.lt.s32.totalorder %s265_s22, %s265_s22 }
  0x18   :  { %vm81_vm1 = vcmp.lt.s32.totalorder %v385_v4, 240  ;;  %v91_v11 = vrot.slane %v71_v9, %v387_v5  ;;  %v95_v12 = vrot.slane %v71_v9, %v94_v6  ;;  %p333_p10 = scmp.lt.s32.totalorder %s331_s24, %s327_s23 }
  0x19   :  { %v87_v10 = vsel %vm81_vm1, %v70_v8, 0.0  ;;  %v119_v23 = vadd.f32 %v118_v19, %v117_v17 }
  0x1a   :  { %v115_v14 = vmul.f32 %v87_v10, %v87_v10  ;;  %v97_v15 = vsel %vm81_vm1, %v95_v12, 0  ;;  %v103_v16 = vrot.slane %v91_v11, %v387_v5  ;;  %p334_p11 = por %p333_p10, %p332_p9 }
  0x1b   :  { %v107_v18 = vrot.slane %v97_v15, %v387_v5  ;;  %v120_v27 = vrot.slane %v119_v23, 2 }
  0x1c   :  { %v124_v20 = vsel %vm116_vm2, %v115_v14, 0.0  ;;  %vm108_vm3 = vcmp.eq.s32.totalorder %v89_v3, %v103_v16  ;;  %p335_p12 = pnand %p334_p11, %p328_p8 }
  0x1d   :  { %v125_v21 = vrot.slane %v124_v20, 4  ;;  %vm109_vm4 = vcmp.eq.s32.totalorder %v89_v3, %v107_v18  ;;  %v278_v22 = vsel %vm108_vm3, 1.0, %v354_v1  ;;  %v121_v31 = vadd.f32 %v120_v27, %v119_v23 }
  0x1e   :  { %v279_v24 = vsel %vm109_vm4, 1.0, %v354_v1  ;;  %v131_v26 = vmul.f32 %v278_v22, %v69_v7 }
  0x1f   :  { %v126_v25 = vadd.f32 %v125_v21, %v124_v20  ;;  %v132_v28 = vmul.f32 %v279_v24, %v87_v10  ;;  %v122_v36 = vrot.slane %v121_v31, 1 }
  0x20   :  { %v133_v30 = vsel %vm116_vm2, %v131_v26, 0.0 }
  0x21   :  { %v127_v29 = vrot.slane %v126_v25, 2  ;;  %v134_v32 = vrot.slane %v133_v30, 4  ;;  %v140_v33 = vsel %vm116_vm2, %v132_v28, 0.0  ;;  %v404_v40 = vadd.f32 %v122_v36, %v121_v31 }
  0x22   :  { %v141_v35 = vrot.slane %v140_v33, 4 }
  0x23   :  { %v128_v34 = vadd.f32 %v127_v29, %v126_v25  ;;  %v135_v37 = vadd.f32 %v134_v32, %v133_v30  ;;  %v155_v44 = vmax.f32 %v404_v40, 1e-24 }
  0x24   :  { %v142_v39 = vadd.f32 %v141_v35, %v140_v33  ;;  %v147_v33 = vmax.f32 %v404_v40, 1e-16 }
  0x25   :  { %v129_v38 = vrot.slane %v128_v34, 1  ;;  %v136_v42 = vrot.slane %v135_v37, 2  ;;  %285 = vrsqrt.f32 %v155_v44 }
  0x26   :  { %v143_v43 = vrot.slane %v142_v39, 2 }
  0x27   :  { %v406_v41 = vadd.f32 %v129_v38, %v128_v34  ;;  %v137_v46 = vadd.f32 %v136_v42, %v135_v37 }
  0x28   :  { %v144_v47 = vadd.f32 %v143_v43, %v142_v39 }
  0x29   :  { %v156_v45 = vmax.f32 %v406_v41, 1e-24  ;;  %v138_v48 = vrot.slane %v137_v46, 1  ;;  %v148_v35 = vmax.f32 %v406_v41, 1e-16 }
  0x2a   :  { %v145_v49 = vrot.slane %v144_v47, 1 }
  0x2b   :  { %287 = vrsqrt.f32 %v156_v45  ;;  %v410_v50 = vadd.f32 %v138_v48, %v137_v46 }
  0x2c   :  { %v412_v51 = vadd.f32 %v145_v49, %v144_v47 }
  0x2f   :  { %v286_v52 = vpop.eup %285 }
  0x30   :  { %v159_v54 = vmul.f32 %v286_v52, %v69_v7  ;;  %v415_v55 = vmul.f32 %v286_v52, %v410_v50 }
  0x32   :  { %v161_v58 = vsel %vm116_vm2, %v159_v54, -inf }
  0x33   :  { %v162_v59 = vrot.slane %v161_v58, 4 }
  0x35   :  { %v288_v53 = vpop.eup %287  ;;  %v163_v62 = vmax.f32 %v161_v58, %v162_v59 }
  0x36   :  { %v160_v56 = vmul.f32 %v288_v53, %v87_v10  ;;  %v418_v57 = vmul.f32 %v288_v53, %v412_v51 }
  0x37   :  { %v164_v0 = vrot.slane %v163_v62, 2 }
  0x38   :  { %v168_v60 = vsel %vm116_vm2, %v160_v56, -inf }
  0x39   :  { %v169_v61 = vrot.slane %v168_v60, 4  ;;  %v165_v2 = vmax.f32 %v163_v62, %v164_v0 }
  0x3b   :  { %v170_v63 = vmax.f32 %v168_v60, %v169_v61  ;;  %v166_v6 = vrot.slane %v165_v2, 1 }
  0x3d   :  { %v171_v1 = vrot.slane %v170_v63, 2  ;;  %v167_v8 = vmax.f32 %v165_v2, %v166_v6 }
  0x3f   :  { %v172_v3 = vmax.f32 %v170_v63, %v171_v1  ;;  %v175_v10 = vsub.f32 %v159_v54, %v167_v8 }
  0x41   :  { %v173_v7 = vrot.slane %v172_v3, 1  ;;  %v177_v12 = vmul.f32 1.442695, %v175_v10 }
  0x43   :  { %v174_v9 = vmax.f32 %v172_v3, %v173_v7  ;;  %289 = vpow2.f32 %v177_v12 }
  0x45   :  { %v176_v11 = vsub.f32 %v160_v56, %v174_v9 }
  0x47   :  { %v179_v13 = vmul.f32 1.442695, %v176_v11 }
  0x49   :  { %291 = vpow2.f32 %v179_v13 }
  0x4a   :  { %293 = vrsqrt.f32 %v147_v33 }
  0x4b   :  { %295 = vrsqrt.f32 %v148_v35 }
  0x4d   :  { %v290_v14 = vpop.eup %289 }
  0x4e   :  { %v181_v16 = vsel %vm116_vm2, %v290_v14, 0.0  ;;  %v205_v17 = vmul.f32 %v290_v14, %v278_v22 }
  0x4f   :  { %v182_v18 = vrot.slane %v181_v16, 4 }
  0x50   :  { %v207_v23 = vsel %vm116_vm2, %v205_v17, 0.0 }
  0x51   :  { %v183_v25 = vadd.f32 %v182_v18, %v181_v16  ;;  %v208_v26 = vrot.slane %v207_v23, 4  ;;  %v355_v18 = vmov 0  }
  0x52   :  { %284 = vset.pattern.permute.xlu0 %v355_v18 }
  0x53   :  { %v292_v15 = vpop.eup %291  ;;  %v184_v30 = vrot.slane %v183_v25, 2  ;;  %v209_v32 = vadd.f32 %v208_v26, %v207_v23 }
  0x54   :  { %v188_v19 = vsel %vm116_vm2, %v292_v15, 0.0  ;;  %v206_v20 = vmul.f32 %v292_v15, %v279_v24  ;;  %v294_v47 = vpop.eup %293 }
  0x55   :  { %v189_v21 = vrot.slane %v188_v19, 4  ;;  %v185_v34 = vadd.f32 %v184_v30, %v183_v25  ;;  %v210_v38 = vrot.slane %v209_v32, 2  ;;  %v296_v48 = vpop.eup %295  ;;  %v151_v0 = vmul.f32 %v294_v47, %v410_v50 }
  0x56   :  { %v214_v27 = vsel %vm116_vm2, %v206_v20, 0.0  ;;  %v152_v3 = vmul.f32 %v296_v48, %v412_v51  ;;  %v237_v51 = vld [vmem:[#allocation2] sm:$0x1] }
  0x57   :  { %v190_v28 = vadd.f32 %v189_v21, %v188_v19  ;;  %v215_v29 = vrot.slane %v214_v27, 4  ;;  %v186_v24 = vrot.slane %v185_v34, 1  ;;  %v211_v44 = vadd.f32 %v210_v38, %v209_v32 }
  0x58   :  { %v153_v12 = vsub.f32 1.0, %v151_v0  ;;  %v154_v14 = vsub.f32 1.0, %v152_v3 }
  0x59   :  { %v191_v31 = vrot.slane %v190_v28, 2  ;;  %v216_v22 = vadd.f32 %v215_v29, %v214_v27  ;;  %v187_v39 = vadd.f32 %v186_v24, %v185_v34  ;;  %v212_v40 = vrot.slane %v211_v44, 1 }
  0x5b   :  { %v192_v36 = vadd.f32 %v191_v31, %v190_v28  ;;  %v217_v42 = vrot.slane %v216_v22, 2  ;;  %297 = vlog2.f32 %v187_v39  ;;  %v213_v41 = vadd.f32 %v212_v40, %v211_v44 }
  0x5d   :  { %v193_v37 = vrot.slane %v192_v36, 1  ;;  %v218_v45 = vadd.f32 %v217_v42, %v216_v22 }
  0x5f   :  { %v194_v43 = vadd.f32 %v193_v37, %v192_v36  ;;  %v219_v46 = vrot.slane %v218_v45, 1 }
  0x61   :  { %299 = vlog2.f32 %v194_v43  ;;  %v220_v52 = vadd.f32 %v219_v46, %v218_v45 }
  0x62   :  { %301 = vrcp.f32 %v187_v39 }
  0x63   :  { %303 = vrcp.f32 %v194_v43 }
  0x65   :  { %v298_v49 = vpop.eup %297 }
  0x66   :  { %v198_v54 = vmul.f32 0.6931472, %v298_v49 }
  0x68   :  { %v201_v60 = vadd.f32 %v198_v54, %v167_v8 }
  0x6a   :  { %v203_v1 = vsub.f32 %v201_v60, %v415_v55 }
  0x6b   :  { %v300_v53 = vpop.eup %299 }
  0x6c   :  { %v302_v56 = vpop.eup %301  ;;  %v200_v58 = vmul.f32 0.6931472, %v300_v53 }
  0x6d   :  { %v304_v59 = vpop.eup %303  ;;  %v222_v61 = vmul.f32 %v302_v56, %v213_v41 }
  0x6e   :  { %v202_v62 = vadd.f32 %v200_v58, %v174_v9  ;;  %v224_v63 = vmul.f32 %v304_v59, %v220_v52 }
  0x6f   :  { %v225_v2 = vsub.f32 1.0, %v222_v61 }
  0x70   :  { %v204_v6 = vsub.f32 %v202_v62, %v418_v57  ;;  %v226_v7 = vsub.f32 1.0, %v224_v63 }
  0x71   :  { %v227_v10 = vmul.f32 %v225_v2, %v225_v2 }
  0x72   :  { %v228_v11 = vmul.f32 %v226_v7, %v226_v7 }
  0x73   :  { %v229_v13 = vmul.f32 %v227_v10, %v203_v1 }
  0x74   :  { %v230_v15 = vmul.f32 %v228_v11, %v204_v6 }
  0x75   :  { %v231_v8 = vmul.f32 0.1, %v229_v13 }
  0x76   :  { %v232_v16 = vmul.f32 0.1, %v230_v15 }
  0x77   :  { %v233_v9 = vadd.f32 %v231_v8, %v153_v12 }
  0x78   :  { %v234_v17 = vadd.f32 %v232_v16, %v154_v14 }
  0x7a   :  { %v236_v50 = vsel %vm81_vm1, %v234_v17, 0.0 }
  0x7b   :  { %v238_v55 = vadd.f32 %v236_v50, %v233_v9 }
  0x7d   :  { %239 = vadd.xlane.f32.xlu0 %v238_v55 }
 0x10a   :  { %v240_v57 = vpop.xlane.xlu0 %239 }
 0x10b   :  { %v241_v19 = vadd.f32 %v240_v57, %v237_v51 }
 0x10d   :  { %243 = vst.msk [vmem:[#allocation2] sm:$0x1] %vm67_vm0, %v241_v19 }
 0x114   :  { %v247_v20 = vld [vmem:[#allocation2] sm:$0x1] }
 0x115   :  { %250 = vperm.xlu0 %284, %v247_v20  }
 0x194   :  { %v251_v21 = vpop.permute.xlu0 %250 }
 0x195   :  { %v256_v23 = vrot.slane %v251_v21, %v387_v5 }
 0x197   :  { %257 = vst [vmem:[#allocation6] sm:$0x1] %v256_v23 }
 0x198   :  { %338 = shalt.err (!%p335_p12)
}
 0x199   :  { %s339_s27 = scalar_lea.hbm %s450_s2, 16 }
 0x19a   :  { %p340_p13 = scmp.ne.s32.totalorder %s450_s2, %s339_s27  ;;  %p343_p0 = scmp.lt.u32.totalorder %s339_s27, %s450_s2 }
 0x19c   :  { %p345_p1 = pnand %p343_p0, %p340_p13 }
 0x19e   :  { %348 = shalt.err (!%p345_p1)
}
 0x19f   :  { %267 = dma.vmem_to_hbm [thread:$0]  %s265_s22, 16, %s450_s2, [#allocation5]  }
 0x1a0   :  { %351 = dma.done.wait [#allocation5], 16  }
 0x1a1   :  { %352 = vsyncadd [#allocation5], 4294967280 }
 0x1a2   :  { %271 = vsyncpa [#allocation4], 1 }
 0x1a3   :  { %272 = vsyncpa [#allocation5], 1 }

</bundles_post_ra>
